<compile_context>
chip_gen: v5e
topology: v5e:2x2
jax: 0.10.0
libtpu: 0.0.40
codegen_flags: <defaults>
</compile_context>

<pallas_src>
import functools

import jax
import jax.numpy as jnp
from jax.experimental import pallas as pl
from jax.experimental.pallas import tpu as pltpu


def dynamic_embedding_kernel(ids_ref, len_ref, tab_ref, out_ref, acc_ref, *, method):
    """One grid step: batch tile `b` (parallel) x vocab tile `v` (reduction).

    ids_ref : [L, TB]  int32   (batch on lanes)
    len_ref : [1, TB]  float32
    tab_ref : [E, TV]  float32 (transposed, vocab-tiled embedding table)
    out_ref : [E, TB]  float32 (lane-dense output, written only at the last v)
    acc_ref : [E, TB]  float32 VMEM scratch, resident across the vocab axis
    """
    v = pl.program_id(1)

    @pl.when(v == 0)
    def _init():
        acc_ref[...] = jnp.zeros_like(acc_ref)

    ids = ids_ref[...]                        # [L, TB] int32
    L, TB = ids.shape
    TV = tab_ref.shape[1]

    # Global vocab ids covered by this table tile (hoisted out of the L loop).
    vocab = jax.lax.broadcasted_iota(jnp.int32, (TV, TB), 0) + v * TV   # [TV, TB]

    # Per-row id counts for this vocab tile.  padding_idx=0 (and any id < 1) is
    # masked directly in the same compare, so padding contributes nothing no
    # matter what table row 0 holds.  Only 2-D [TV, TB] intermediates.
    # NOTE: out-of-range ids (>= V) silently contribute nothing (PyTorch raises).
    counts = jnp.zeros((TV, TB), jnp.float32)
    for l in range(L):                        # L is small & static -> unrolled
        row = ids[l:l + 1, :]                 # [1, TB]
        hit = jnp.logical_and(row == vocab, row > 0)
        counts = counts + hit.astype(jnp.float32)

    # Embedding gather + sum over the sequence == MXU contraction with counts.
    acc_ref[...] += jnp.dot(tab_ref[...], counts,
                            preferred_element_type=jnp.float32)   # [E, TB]

    @pl.when(v == pl.num_programs(1) - 1)
    def _finalize():
        res = acc_ref[...]
        if method == 'avg':
            # EUP reciprocal (approx) -> effectively free normalization.
            res = res * pl.reciprocal(len_ref[...], approx=True)  # bcast [1, TB]
        out_ref[...] = res.astype(out_ref.dtype)


def dynamic_embedding(ids, lengths, table, method='avg', *, tb=None, tv=None):
    """ids: [B, L] int (0 = padding), lengths: [B, 1] float, table: [V, E] float.

    Returns [B, E] = sum_l table[ids] (/ lengths if method == 'avg').
    """
    assert method in ('avg', 'sum')
    B, L = ids.shape
    V, E = table.shape

    # ---- wrapper-side layout plumbing (no compute) -------------------------
    ids_t = jnp.asarray(ids, jnp.int32).T                       # [L, B]
    len_t = jnp.asarray(lengths, jnp.float32).reshape(1, B)     # [1, B]
    # Pad the vocab to a multiple of 128 and store the table transposed so each
    # DMA'd table tile has the vocab on the lane axis (clean MXU orientation).
    Vp = ((V + 127) // 128) * 128
    tab_t = jnp.pad(jnp.asarray(table, jnp.float32), ((0, Vp - V), (0, 0))).T  # [E, Vp]

    # ---- tile sizes (lane dims must be multiples of 128 or the full dim) ----
    if tb is None:
        tb = 128 if B % 128 == 0 else B
    if tv is None:
        tv = 512 if Vp % 512 == 0 else 128
    assert B % tb == 0 and Vp % tv == 0

    grid = (B // tb, Vp // tv)     # (parallel batch tiles, vocab reduction tiles)

    kernel = functools.partial(dynamic_embedding_kernel, method=method)
    out_t = pl.pallas_call(
        kernel,
        out_shape=jax.ShapeDtypeStruct((E, B), jnp.float32),
        grid_spec=pltpu.PrefetchScalarGridSpec(
            num_scalar_prefetch=0,
            grid=grid,
            in_specs=[
                pl.BlockSpec((L, tb), lambda b, v: (0, b)),   # ids (batch on lanes)
                pl.BlockSpec((1, tb), lambda b, v: (0, b)),   # lengths
                pl.BlockSpec((E, tv), lambda b, v: (0, v)),   # table tile
            ],
            out_specs=pl.BlockSpec((E, tb), lambda b, v: (0, b)),
            scratch_shapes=[pltpu.VMEM((E, tb), jnp.float32)],  # resident accumulator
        ),
        compiler_params=pltpu.CompilerParams(
            dimension_semantics=("parallel", "arbitrary"),
            vmem_limit_bytes=32 * 1024 * 1024,
        ),
    )(ids_t, len_t, tab_t)

    return out_t.T                                              # [B, E]


if __name__ == "__main__":
    # Module hyperparameters (deterministic, in-script init)
    max_idx = 200          # vocab size
    embedding_dim = 8
    B, L = 4, 8            # batch size, max feature size

    key = jax.random.PRNGKey(0)
    k_tab, k_ids, k_len = jax.random.split(key, 3)

    # nn.Embedding(max_idx, E, padding_idx=0): row 0 zeroed.  (The kernel also
    # masks id==0 itself, so it does not rely on this.)
    table = jax.random.normal(k_tab, (max_idx, embedding_dim), dtype=jnp.float32)
    table = table.at[0].set(0.0)

    # Dynamic ids: valid ids in [1, max_idx), padded with 0 beyond each length.
    lengths_i = jax.random.randint(k_len, (B,), 1, L + 1)            # [B]
    raw_ids = jax.random.randint(k_ids, (B, L), 1, max_idx)          # [B, L]
    pos = jnp.arange(L)[None, :]
    ids = jnp.where(pos < lengths_i[:, None], raw_ids, 0).astype(jnp.int32)
    lengths = lengths_i.astype(jnp.float32).reshape(B, 1)            # [B, 1]

    # Pure-JAX reference (same semantics as the PyTorch forward).
    ref_sum = jnp.sum(table[ids], axis=1)
    ref_avg = ref_sum / lengths

    out_avg = jax.block_until_ready(dynamic_embedding(ids, lengths, table, method='avg'))
    out_sum = jax.block_until_ready(dynamic_embedding(ids, lengths, table, method='sum'))

    assert out_avg.shape == (B, embedding_dim)
    assert out_sum.shape == (B, embedding_dim)
    # 'sum' path is exact; 'avg' uses the EUP approximate reciprocal (looser tol).
    assert jnp.allclose(out_sum, ref_sum, atol=1e-5, rtol=1e-5)
    assert jnp.allclose(out_avg, ref_avg, atol=1e-2, rtol=1e-2)

    print("KERNEL_OK")
</pallas_src>

<mosaic_0001>
module attributes {stable_mosaic.version = 11 : i64} {
  func.func @dynamic_embedding_kernel(%arg0: i32, %arg1: i32, %arg2: memref<8x4xi32, #tpu.memory_space<vmem>>, %arg3: memref<1x4xf32, #tpu.memory_space<vmem>>, %arg4: memref<8x128xf32, #tpu.memory_space<vmem>>, %arg5: memref<8x4xf32, #tpu.memory_space<vmem>>, %arg6: memref<8x4xf32, #tpu.memory_space<vmem>>) attributes {dimension_semantics = [#tpu.dimension_semantics<parallel>, #tpu.dimension_semantics<arbitrary>], iteration_bounds = array<i64: 1, 2>, scalar_prefetch = 0 : i64, scratch_operands = 1 : i64, tpu.core_type = #tpu.core_type<tc>, window_params = [{transform_indices = @transform_0, window_bounds = array<i64: 8, 4>}, {transform_indices = @transform_1, window_bounds = array<i64: 1, 4>}, {transform_indices = @transform_2, window_bounds = array<i64: 8, 128>}, {transform_indices = @transform_3, window_bounds = array<i64: 8, 4>}]} {
    %c0_i32 = arith.constant 0 : i32
    %0 = arith.cmpi eq, %arg1, %c0_i32 : i32
    %1 = arith.extui %0 : i1 to i32
    %c0_i32_0 = arith.constant 0 : i32
    %2 = arith.cmpi ne, %1, %c0_i32_0 : i32
    scf.if %2 {
      %cst_18 = arith.constant 0.000000e+00 : f32
      %97 = vector.broadcast %cst_18 : f32 to vector<8x4xf32>
      %c0_19 = arith.constant 0 : index
      %c0_20 = arith.constant 0 : index
      %98 = vector.load %arg6[%c0_19, %c0_20] : memref<8x4xf32, #tpu.memory_space<vmem>>, vector<8x4xf32>
      tpu.vector_store %arg6[%c0_19, %c0_20], %97 {strides = array<i32>} : memref<8x4xf32, #tpu.memory_space<vmem>>, vector<8x4xf32>,
    } else {
    }
    %c0 = arith.constant 0 : index
    %c0_1 = arith.constant 0 : index
    %3 = vector.load %arg2[%c0, %c0_1] : memref<8x4xi32, #tpu.memory_space<vmem>>, vector<8x4xi32>
    %4 = tpu.iota {dimensions = array<i32: 0>} : vector<128x4xi32>
    %c128_i32 = arith.constant 128 : i32
    %5 = arith.muli %arg1, %c128_i32 : i32
    %6 = vector.broadcast %5 : i32 to vector<128x4xi32>
    %7 = arith.addi %4, %6 : vector<128x4xi32>
    %cst = arith.constant 0.000000e+00 : f32
    %8 = vector.broadcast %cst : f32 to vector<128x4xf32>
    %9 = vector.extract_strided_slice %3 {offsets = [0, 0], sizes = [1, 4], strides = [1, 1]} : vector<8x4xi32> to vector<1x4xi32>
    %10 = vector.broadcast %9 : vector<1x4xi32> to vector<128x4xi32>
    %11 = arith.cmpi eq, %10, %7 : vector<128x4xi32>
    %c0_i32_2 = arith.constant 0 : i32
    %12 = vector.broadcast %c0_i32_2 : i32 to vector<1x4xi32>
    %13 = arith.cmpi sgt, %9, %12 : vector<1x4xi32>
    %14 = vector.broadcast %13 : vector<1x4xi1> to vector<128x4xi1>
    %15 = arith.andi %11, %14 : vector<128x4xi1>
    %16 = arith.extui %15 : vector<128x4xi1> to vector<128x4xi32>
    %17 = arith.sitofp %16 : vector<128x4xi32> to vector<128x4xf32>
    %18 = arith.addf %8, %17 : vector<128x4xf32>
    %19 = vector.extract_strided_slice %3 {offsets = [1, 0], sizes = [1, 4], strides = [1, 1]} : vector<8x4xi32> to vector<1x4xi32>
    %20 = vector.broadcast %19 : vector<1x4xi32> to vector<128x4xi32>
    %21 = arith.cmpi eq, %20, %7 : vector<128x4xi32>
    %c0_i32_3 = arith.constant 0 : i32
    %22 = vector.broadcast %c0_i32_3 : i32 to vector<1x4xi32>
    %23 = arith.cmpi sgt, %19, %22 : vector<1x4xi32>
    %24 = vector.broadcast %23 : vector<1x4xi1> to vector<128x4xi1>
    %25 = arith.andi %21, %24 : vector<128x4xi1>
    %26 = arith.extui %25 : vector<128x4xi1> to vector<128x4xi32>
    %27 = arith.sitofp %26 : vector<128x4xi32> to vector<128x4xf32>
    %28 = arith.addf %18, %27 : vector<128x4xf32>
    %29 = vector.extract_strided_slice %3 {offsets = [2, 0], sizes = [1, 4], strides = [1, 1]} : vector<8x4xi32> to vector<1x4xi32>
    %30 = vector.broadcast %29 : vector<1x4xi32> to vector<128x4xi32>
    %31 = arith.cmpi eq, %30, %7 : vector<128x4xi32>
    %c0_i32_4 = arith.constant 0 : i32
    %32 = vector.broadcast %c0_i32_4 : i32 to vector<1x4xi32>
    %33 = arith.cmpi sgt, %29, %32 : vector<1x4xi32>
    %34 = vector.broadcast %33 : vector<1x4xi1> to vector<128x4xi1>
    %35 = arith.andi %31, %34 : vector<128x4xi1>
    %36 = arith.extui %35 : vector<128x4xi1> to vector<128x4xi32>
    %37 = arith.sitofp %36 : vector<128x4xi32> to vector<128x4xf32>
    %38 = arith.addf %28, %37 : vector<128x4xf32>
    %39 = vector.extract_strided_slice %3 {offsets = [3, 0], sizes = [1, 4], strides = [1, 1]} : vector<8x4xi32> to vector<1x4xi32>
    %40 = vector.broadcast %39 : vector<1x4xi32> to vector<128x4xi32>
    %41 = arith.cmpi eq, %40, %7 : vector<128x4xi32>
    %c0_i32_5 = arith.constant 0 : i32
    %42 = vector.broadcast %c0_i32_5 : i32 to vector<1x4xi32>
    %43 = arith.cmpi sgt, %39, %42 : vector<1x4xi32>
    %44 = vector.broadcast %43 : vector<1x4xi1> to vector<128x4xi1>
    %45 = arith.andi %41, %44 : vector<128x4xi1>
    %46 = arith.extui %45 : vector<128x4xi1> to vector<128x4xi32>
    %47 = arith.sitofp %46 : vector<128x4xi32> to vector<128x4xf32>
    %48 = arith.addf %38, %47 : vector<128x4xf32>
    %49 = vector.extract_strided_slice %3 {offsets = [4, 0], sizes = [1, 4], strides = [1, 1]} : vector<8x4xi32> to vector<1x4xi32>
    %50 = vector.broadcast %49 : vector<1x4xi32> to vector<128x4xi32>
    %51 = arith.cmpi eq, %50, %7 : vector<128x4xi32>
    %c0_i32_6 = arith.constant 0 : i32
    %52 = vector.broadcast %c0_i32_6 : i32 to vector<1x4xi32>
    %53 = arith.cmpi sgt, %49, %52 : vector<1x4xi32>
    %54 = vector.broadcast %53 : vector<1x4xi1> to vector<128x4xi1>
    %55 = arith.andi %51, %54 : vector<128x4xi1>
    %56 = arith.extui %55 : vector<128x4xi1> to vector<128x4xi32>
    %57 = arith.sitofp %56 : vector<128x4xi32> to vector<128x4xf32>
    %58 = arith.addf %48, %57 : vector<128x4xf32>
    %59 = vector.extract_strided_slice %3 {offsets = [5, 0], sizes = [1, 4], strides = [1, 1]} : vector<8x4xi32> to vector<1x4xi32>
    %60 = vector.broadcast %59 : vector<1x4xi32> to vector<128x4xi32>
    %61 = arith.cmpi eq, %60, %7 : vector<128x4xi32>
    %c0_i32_7 = arith.constant 0 : i32
    %62 = vector.broadcast %c0_i32_7 : i32 to vector<1x4xi32>
    %63 = arith.cmpi sgt, %59, %62 : vector<1x4xi32>
    %64 = vector.broadcast %63 : vector<1x4xi1> to vector<128x4xi1>
    %65 = arith.andi %61, %64 : vector<128x4xi1>
    %66 = arith.extui %65 : vector<128x4xi1> to vector<128x4xi32>
    %67 = arith.sitofp %66 : vector<128x4xi32> to vector<128x4xf32>
    %68 = arith.addf %58, %67 : vector<128x4xf32>
    %69 = vector.extract_strided_slice %3 {offsets = [6, 0], sizes = [1, 4], strides = [1, 1]} : vector<8x4xi32> to vector<1x4xi32>
    %70 = vector.broadcast %69 : vector<1x4xi32> to vector<128x4xi32>
    %71 = arith.cmpi eq, %70, %7 : vector<128x4xi32>
    %c0_i32_8 = arith.constant 0 : i32
    %72 = vector.broadcast %c0_i32_8 : i32 to vector<1x4xi32>
    %73 = arith.cmpi sgt, %69, %72 : vector<1x4xi32>
    %74 = vector.broadcast %73 : vector<1x4xi1> to vector<128x4xi1>
    %75 = arith.andi %71, %74 : vector<128x4xi1>
    %76 = arith.extui %75 : vector<128x4xi1> to vector<128x4xi32>
    %77 = arith.sitofp %76 : vector<128x4xi32> to vector<128x4xf32>
    %78 = arith.addf %68, %77 : vector<128x4xf32>
    %79 = vector.extract_strided_slice %3 {offsets = [7, 0], sizes = [1, 4], strides = [1, 1]} : vector<8x4xi32> to vector<1x4xi32>
    %80 = vector.broadcast %79 : vector<1x4xi32> to vector<128x4xi32>
    %81 = arith.cmpi eq, %80, %7 : vector<128x4xi32>
    %c0_i32_9 = arith.constant 0 : i32
    %82 = vector.broadcast %c0_i32_9 : i32 to vector<1x4xi32>
    %83 = arith.cmpi sgt, %79, %82 : vector<1x4xi32>
    %84 = vector.broadcast %83 : vector<1x4xi1> to vector<128x4xi1>
    %85 = arith.andi %81, %84 : vector<128x4xi1>
    %86 = arith.extui %85 : vector<128x4xi1> to vector<128x4xi32>
    %87 = arith.sitofp %86 : vector<128x4xi32> to vector<128x4xf32>
    %88 = arith.addf %78, %87 : vector<128x4xf32>
    %c0_10 = arith.constant 0 : index
    %c0_11 = arith.constant 0 : index
    %89 = vector.load %arg6[%c0_10, %c0_11] : memref<8x4xf32, #tpu.memory_space<vmem>>, vector<8x4xf32>
    %c0_12 = arith.constant 0 : index
    %c0_13 = arith.constant 0 : index
    %90 = vector.load %arg4[%c0_12, %c0_13] : memref<8x128xf32, #tpu.memory_space<vmem>>, vector<8x128xf32>
    %cst_14 = arith.constant dense<0.000000e+00> : vector<8x4xf32>
    %91 = tpu.matmul %90, %88, %cst_14 {dimension_numbers = #tpu.dot_dimension_numbers<[1], [0], [0], [1], [0, 0, 1, 1], [], []>} : vector<8x128xf32>, vector<128x4xf32>, vector<8x4xf32> -> vector<8x4xf32>
    %92 = arith.addf %89, %91 : vector<8x4xf32>
    %c0_15 = arith.constant 0 : index
    %c0_16 = arith.constant 0 : index
    %93 = vector.load %arg6[%c0_15, %c0_16] : memref<8x4xf32, #tpu.memory_space<vmem>>, vector<8x4xf32>
    tpu.vector_store %arg6[%c0_15, %c0_16], %92 {strides = array<i32>} : memref<8x4xf32, #tpu.memory_space<vmem>>, vector<8x4xf32>,
    %c1_i32 = arith.constant 1 : i32
    %94 = arith.cmpi eq, %arg1, %c1_i32 : i32
    %95 = arith.extui %94 : i1 to i32
    %c0_i32_17 = arith.constant 0 : i32
    %96 = arith.cmpi ne, %95, %c0_i32_17 : i32
    scf.if %96 {
      %c0_18 = arith.constant 0 : index
      %c0_19 = arith.constant 0 : index
      %97 = vector.load %arg6[%c0_18, %c0_19] : memref<8x4xf32, #tpu.memory_space<vmem>>, vector<8x4xf32>
      %c0_20 = arith.constant 0 : index
      %c0_21 = arith.constant 0 : index
      %98 = vector.load %arg3[%c0_20, %c0_21] : memref<1x4xf32, #tpu.memory_space<vmem>>, vector<1x4xf32>
      %99 = tpu.reciprocal %98 {approx = true} : vector<1x4xf32> -> vector<1x4xf32>
      %100 = vector.broadcast %99 : vector<1x4xf32> to vector<8x4xf32>
      %101 = arith.mulf %97, %100 : vector<8x4xf32>
      %c0_22 = arith.constant 0 : index
      %c0_23 = arith.constant 0 : index
      %102 = vector.load %arg5[%c0_22, %c0_23] : memref<8x4xf32, #tpu.memory_space<vmem>>, vector<8x4xf32>
      tpu.vector_store %arg5[%c0_22, %c0_23], %101 {strides = array<i32>} : memref<8x4xf32, #tpu.memory_space<vmem>>, vector<8x4xf32>,
    } else {
    }
    return
  }
  func.func @transform_0(%arg0: i32, %arg1: i32) -> (i32, i32) {
    %c0_i32 = arith.constant 0 : i32
    %c0_i32_0 = arith.constant 0 : i32
    return %c0_i32, %arg0 : i32, i32
  }
  func.func @transform_1(%arg0: i32, %arg1: i32) -> (i32, i32) {
    %c0_i32 = arith.constant 0 : i32
    %c0_i32_0 = arith.constant 0 : i32
    return %c0_i32, %arg0 : i32, i32
  }
  func.func @transform_2(%arg0: i32, %arg1: i32) -> (i32, i32) {
    %c0_i32 = arith.constant 0 : i32
    %c0_i32_0 = arith.constant 0 : i32
    return %c0_i32, %arg1 : i32, i32
  }
  func.func @transform_3(%arg0: i32, %arg1: i32) -> (i32, i32) {
    %c0_i32 = arith.constant 0 : i32
    %c0_i32_0 = arith.constant 0 : i32
    return %c0_i32, %arg0 : i32, i32
  }
}

</mosaic_0001>

<bundles_post_ra>
// kernel: tpu_custom_call.1
= control target key start
LH: loop header
LB: loop body
LE: loop exit
PB: predicated region body
PF: predicated region fallthrough
CT: control target
= control target key end

     0   :  { %8 = vsyncpa [#allocation4], 0  ;;  %s2169_s0 = inlined_call_operand.vmem [shape: s32[8,4], index: 0, kind: input, shape index: {}]   ;;  %s2170_s1 = inlined_call_operand.vmem [shape: f32[1,4], index: 1, kind: input, shape index: {}]   ;;  %s2171_s2 = inlined_call_operand.hbm [shape: f32[8,256], index: 2, kind: input, shape index: {}]   ;;  %s2172_s3 = inlined_call_operand.vmem [shape: f32[8,4], index: 3, kind: output, shape index: {}]  }
   0x1   :  { %10 = vsyncpa [#allocation4 + $0x1], 0  ;;  %s1381_s12 = smov 0   ;;  %s1383_s13 = smov 0  }
   0x2   :  { %s1385_s14 = smov 0   ;;  %s1387_s15 = smov 0  }
   0x3   :  { %s1389_s16 = smov 0   ;;  %s1391_s17 = smov 0  }
   0x4 LB: > { %s1073_s18 = sadd.s32 4294967295, %s1356_s17   ;;  %s25_s19 = sadd.s32 1, %s1352_s16  ;;  %s1356_s17 = sphi %s1391_s17, %s16_s17   ;;  %s1352_s16 = sphi %s1389_s16, %s2294_s16   ;;  %s1348_s15 = sphi %s1387_s15, %s2293_s15   ;;  %s1344_s14 = sphi %s1385_s14, %s2292_s14   ;;  %s1340_s13 = sphi %s1383_s13, %s2291_s13   ;;  %s1336_s12 = sphi %s1381_s12, %s2290_s12  }
   0x5   : > { %p26_p0 = scmp.ge.s32.totalorder %s25_s19, 2  ;;  %s87_s20 = sadd.s32 1, %s1344_s14 }
   0x6   : > { %p94_p1 = scmp.ne.s32.totalorder %s1344_s14, %s1340_s13  ;;  %p95_p2 = scmp.eq.s32.totalorder %s1356_s17, 0 }
   0x7   : > { %s2296_s19 = smov (%p26_p0, %s25_s19), 0  ;;  %p100_p4 = scmp.ne.s32.totalorder %s1340_s13, %s1336_s12 }
   0x8   : > { %p1417_p3 = por %p95_p2, %p94_p1  ;;  %s84_s22 = ssub.s32 %s1352_s16, %s2296_s19 }
   0x9   : > { %p101_p5 = scmp.eq.s32.totalorder %s1073_s18, 0  ;;  %p85_p6 = scmp.eq.s32.totalorder %s84_s22, 0 }
   0xa   : > { %p1222_p8 = scmp.lt.s32.totalorder %s1356_s17, 2  ;;  %s163_s25 = sand.u32 1, %s1344_s14  }
   0xb   : > { %p1424_p7 = por %p101_p5, %p100_p4  ;;  %s1079_s26 = sshll.u32 %s1352_s16, 3 }
   0xc   : > { %s1430_s24 = scalar_select %p85_p6, %s1344_s14, %s87_s20  }
   0xd   : > { %s1078_s27 = sshll.u32 %s163_s25, 3  ;;  %s171_s30 = scalar_lea.hbm %s2171_s2, %s1079_s26 }
   0xe   : > { %s173_s4 = sshll.u32 %s171_s30, 4  ;;  %s167_s5 = scalar_lea.vmem [#allocation3], %s1078_s27  ;;  %s174_s4 = int_to_ptr.hbm [resolvable:$true] %s173_s4 }
   0xf   : > { %s175_s6 = sshll.u32 %s167_s5, 4  ;;  %p1219_p9 = pnand %p1222_p8, %p1417_p3  ;;  %s176_s6 = int_to_ptr.vmem [resolvable:$true] %s175_s6 }
  0x10   : > { %p1080_p10 = scmp.ge.s32.totalorder %s1356_s17, 1  ;;  %p180_p11 = scmp.lt.s32.totalorder %s1356_s17, 3 }
  0x11   : > { %s164_s7 = scalar_lea.sflag [#allocation4], %s163_s25 }
  0x12   : > { %1221 = dma.hbm_to_vmem [thread:$0]  (!%p1219_p9), %s174_s4, 128, %s176_s6, %s164_s7  }
  0x13   : > { %p181_p12 = pnand %p1080_p10, %p180_p11 }
  0x14   : > { %s186_s8 = sand.u32 (!%p181_p12), 1, %s1340_s13  }
  0x15   : > { %184 = sbr.rel (%p181_p12) target bundleno = 325 (0x145), region = 32  ;;  %s1442_s9 = sshll.u32 (!%p181_p12), %s186_s8, 3 }
  0x16   : > { %s187_s10 = scalar_lea.sflag (!%p181_p12), [#allocation4], %s186_s8  ;;  %s190_s11 = scalar_lea.vmem (!%p181_p12), [#allocation3], %s1442_s9 }
  0x1a   : > { %1331 = dma.done.wait (%p1424_p7), %s187_s10, 128  }
  0x1b   : > { %1333 = vsyncadd (%p1424_p7), %s187_s10, 4294967168  ;;  %p1082_p13 = scmp.ne.s32.totalorder %s1348_s15, 0 }
  0x1d   : > { %234 = sbr.rel (%p1082_p13) target bundleno = 36 (0x24), region = 40 }
  0x22   : > { %vm235_vm0 = vcmask 31744   ;;  %v1358_v0 = vmov 0.0  }
  0x23   : > { %236 = vst.msk [vmem:[#allocation2] sm:$0xff] %vm235_vm0, %v1358_v0 }
  0x24 PF: > { %v237_v1 = vld [vmem:[%s2169_s0] sm:$0xff]  ;;  %v238_v2 = vlaneseq  ;;  %s1083_s20 = sshll.u32 %s1348_s15, 7  ;;  %v1359_v4 = vmov 0   ;;  %v2206_v19 = vmov 0  ;;  %v2208_v20 = vmov 0  ;;  %p1212_p0 = scmp.ne.s32.totalorder %s1348_s15, 1 }
  0x25   : > { %vm290_vm1 = vcmp.gt.s32.totalorder %v237_v1, 0  ;;  %v1456_v6 = vstv %s1083_s20  ;;  %v1459_v11 = vperm.slane %v237_v1, 0  ;;  %v1461_v12 = vperm.slane %v237_v1, 1 }
  0x26   : > { %v1454_v3 = vshrl.u32 %v238_v2, 7  ;;  %v291_v5 = vsel %vm290_vm1, 1, %v1359_v4  ;;  %v1463_v13 = vperm.slane %v237_v1, 2  ;;  %v1465_v14 = vperm.slane %v237_v1, 3 }
  0x27   : > { %v292_v7 = vperm.slane %v291_v5, 0  ;;  %v375_v8 = vperm.slane %v291_v5, 1  ;;  %v458_v9 = vperm.slane %v291_v5, 2  ;;  %v541_v15 = vperm.slane %v291_v5, 3 }
  0x28   : > { %v254_v10 = vadd.s32 120, %v1454_v3  ;;  %v1467_v16 = vperm.slane %v237_v1, 4  ;;  %v624_v17 = vperm.slane %v291_v5, 4  ;;  %v1478_v21 = vperm.slane %v237_v1, 5 }
  0x29   : > { %vm1470_vm2 = vcmp.eq.s32.totalorder %v292_v7, 1  ;;  %vm1474_vm3 = vcmp.eq.s32.totalorder %v375_v8, 1  ;;  %vm1480_vm4 = vcmp.eq.s32.totalorder %v458_v9, 1  ;;  %v2210_v22 = vmov 0 }
  0x2a   : > { %v272_v18 = vadd.s32 %v1456_v6, %v254_v10  ;;  %v2207_v19 = vsel %vm1470_vm2, 4294967295, %v2206_v19  ;;  %v2209_v20 = vsel %vm1474_vm3, 4294967295, %v2208_v20  ;;  %v2211_v22 = vsel %vm1480_vm4, 4294967295, %v2210_v22 }
  0x2b   : > { %v707_v23 = vperm.slane %v291_v5, 5  ;;  %v1484_v24 = vperm.slane %v237_v1, 6  ;;  %v253_v25 = vadd.s32 112, %v1454_v3  ;;  %v790_v26 = vperm.slane %v291_v5, 6 }
  0x2c   : > { %vm289_vm5 = vcmp.eq.s32.totalorder %v1459_v11, %v272_v18  ;;  %vm374_vm6 = vcmp.eq.s32.totalorder %v1461_v12, %v272_v18  ;;  %vm457_vm7 = vcmp.eq.s32.totalorder %v1463_v13, %v272_v18  ;;  %vm540_vm9 = vcmp.eq.s32.totalorder %v1465_v14, %v272_v18 }
  0x2d   : > { %vm309_vm8 = vmand %vm289_vm5, %vm1470_vm2  ;;  %vm1493_vm10 = vcmp.eq.s32.totalorder %v541_v15, 1  ;;  %v2212_v27 = vmov 0  ;;  %v1497_v28 = vperm.slane %v237_v1, 7  ;;  %v873_v29 = vperm.slane %v291_v5, 7 }
  0x2e   : > { %v2213_v27 = vsel %vm1493_vm10, 4294967295, %v2212_v27  ;;  %v1360_v30 = vmov 0.0   ;;  %vm392_vm11 = vmand %vm374_vm6, %vm1474_vm3  ;;  %vm623_vm12 = vcmp.eq.s32.totalorder %v1467_v16, %v272_v18  ;;  %vm1503_vm13 = vcmp.eq.s32.totalorder %v624_v17, 1 }
  0x2f   : > { %v1099_v31 = vsel %vm309_vm8, 1.0, %v1360_v30  ;;  %v2214_v32 = vmov 0  ;;  %v1115_v33 = vsel %vm392_vm11, 1.0, %v1360_v30  ;;  %vm475_vm14 = vmand %vm457_vm7, %vm1480_vm4  ;;  %vm706_vm15 = vcmp.eq.s32.totalorder %v1478_v21, %v272_v18 }
  0x30   : > { %v2215_v32 = vsel %vm1503_vm13, 4294967295, %v2214_v32  ;;  %vm1511_vm0 = vcmp.eq.s32.totalorder %v707_v23, 1  ;;  %v2216_v34 = vmov 0  ;;  %v271_v35 = vadd.s32 %v1456_v6, %v253_v25  ;;  %vm558_vm1 = vmand %vm540_vm9, %vm1493_vm10 }
  0x31   : > { %v2217_v34 = vsel %vm1511_vm0, 4294967295, %v2216_v34  ;;  %v440_v36 = vadd.f32 %v1115_v33, %v1099_v31  ;;  %v1131_v37 = vsel %vm475_vm14, 1.0, %v1360_v30  ;;  %vm789_vm5 = vcmp.eq.s32.totalorder %v1484_v24, %v272_v18  ;;  %vm641_vm7 = vmand %vm623_vm12, %vm1503_vm13 }
  0x32   : > { %vm1522_vm6 = vcmp.eq.s32.totalorder %v790_v26, 1  ;;  %v2218_v38 = vmov 0  ;;  %v1147_v39 = vsel %vm558_vm1, 1.0, %v1360_v30  ;;  %vm872_vm8 = vcmp.eq.s32.totalorder %v1497_v28, %v272_v18  ;;  %vm724_vm9 = vmand %vm706_vm15, %vm1511_vm0 }
  0x33   : > { %v2219_v38 = vsel %vm1522_vm6, 4294967295, %v2218_v38  ;;  %vm1530_vm11 = vcmp.eq.s32.totalorder %v873_v29, 1  ;;  %v523_v41 = vadd.f32 %v1131_v37, %v440_v36  ;;  %vm288_vm14 = vcmp.eq.s32.totalorder %v1459_v11, %v271_v35  ;;  %vm807_vm1 = vmand %vm789_vm5, %vm1522_vm6 }
  0x34   : > { %v252_v42 = vadd.s32 104, %v1454_v3  ;;  %v1163_v43 = vsel %vm641_vm7, 1.0, %v1360_v30  ;;  %vm373_vm12 = vcmp.eq.s32.totalorder %v1461_v12, %v271_v35  ;;  %vm1544_vm13 = vmand %vm872_vm8, %vm1530_vm11  ;;  %vm456_vm15 = vcmp.eq.s32.totalorder %v1463_v13, %v271_v35 }
  0x35   : > { %v606_v44 = vadd.f32 %v1147_v39, %v523_v41  ;;  %v1179_v46 = vsel %vm724_vm9, 1.0, %v1360_v30  ;;  %vm308_vm0 = vmand %vm288_vm14, %vm1470_vm2  ;;  %vm539_vm7 = vcmp.eq.s32.totalorder %v1465_v14, %v271_v35  ;;  %vm622_vm8 = vcmp.eq.s32.totalorder %v1467_v16, %v271_v35 }
  0x36   : > { %v1098_v48 = vsel %vm308_vm0, 1.0, %v1360_v30  ;;  %vm391_vm5 = vmand %vm373_vm12, %vm1474_vm3  ;;  %v270_v49 = vadd.s32 %v1456_v6, %v252_v42  ;;  %v1195_v50 = vsel %vm807_vm1, 1.0, %v1360_v30  ;;  %vm705_vm14 = vcmp.eq.s32.totalorder %v1478_v21, %v271_v35 }
  0x37   : > { %v689_v47 = vadd.f32 %v1163_v43, %v606_v44  ;;  %v1114_v51 = vsel %vm391_vm5, 1.0, %v1360_v30  ;;  %vm474_vm9 = vmand %vm456_vm15, %vm1480_vm4  ;;  %vm788_vm12 = vcmp.eq.s32.totalorder %v1484_v24, %v271_v35  ;;  %v1211_v55 = vsel %vm1544_vm13, 1.0, %v1360_v30 }
  0x38   : > { %v439_v53 = vadd.f32 %v1114_v51, %v1098_v48  ;;  %v1130_v54 = vsel %vm474_vm9, 1.0, %v1360_v30  ;;  %vm557_vm0 = vmand %vm539_vm7, %vm1493_vm10  ;;  %vm2224_vm1 = vnez %v2215_v32  ;;  %vm871_vm5 = vcmp.eq.s32.totalorder %v1497_v28, %v271_v35 }
  0x39   : > { %v772_v52 = vadd.f32 %v1179_v46, %v689_v47  ;;  %v1146_v56 = vsel %vm557_vm0, 1.0, %v1360_v30  ;;  %vm640_vm15 = vmand %vm622_vm8, %vm2224_vm1  ;;  %vm2225_vm9 = vnez %v2217_v34  ;;  %vm287_vm7 = vcmp.eq.s32.totalorder %v1459_v11, %v270_v49 }
  0x3a   : > { %v522_v58 = vadd.f32 %v1130_v54, %v439_v53  ;;  %vm723_vm4 = vmand %vm705_vm14, %vm2225_vm9  ;;  %v251_v59 = vadd.s32 96, %v1454_v3  ;;  %v1162_v60 = vsel %vm640_vm15, 1.0, %v1360_v30  ;;  %vm372_vm0 = vcmp.eq.s32.totalorder %v1461_v12, %v270_v49 }
  0x3b   : > { %v855_v57 = vadd.f32 %v1195_v50, %v772_v52  ;;  %vm806_vm13 = vmand %vm788_vm12, %vm1522_vm6  ;;  %vm455_vm14 = vcmp.eq.s32.totalorder %v1463_v13, %v270_v49  ;;  %v1178_v0 = vsel %vm723_vm4, 1.0, %v1360_v30  ;;  %vm538_vm9 = vcmp.eq.s32.totalorder %v1465_v14, %v270_v49 }
  0x3c   : > { %v605_v62 = vadd.f32 %v1146_v56, %v522_v58  ;;  %vm1584_vm8 = vmand %vm871_vm5, %vm1530_vm11  ;;  %vm621_vm5 = vcmp.eq.s32.totalorder %v1467_v16, %v270_v49  ;;  %v269_v4 = vadd.s32 %v1456_v6, %v251_v59  ;;  %v1194_v5 = vsel %vm806_vm13, 1.0, %v1360_v30 }
  0x3d   : > { %v938_v61 = vadd.f32 %v1211_v55, %v855_v57  ;;  %vm307_vm15 = vmand %vm287_vm7, %vm1470_vm2  ;;  %vm2228_vm4 = vnez %v2211_v22  ;;  %vm704_vm2 = vcmp.eq.s32.totalorder %v1478_v21, %v270_v49  ;;  %v1210_v15 = vsel %vm1584_vm8, 1.0, %v1360_v30 }
  0x3e   : > { %v688_v1 = vadd.f32 %v1162_v60, %v605_v62  ;;  %v1097_v2 = vsel %vm307_vm15, 1.0, %v1360_v30  ;;  %vm390_vm12 = vmand %vm372_vm0, %vm1474_vm3  ;;  %vm787_vm15 = vcmp.eq.s32.totalorder %v1484_v24, %v270_v49  ;;  %v250_v25 = vadd.s32 88, %v1454_v3 }
  0x3f   : > { %941 = vmatpush.msra.mxu0 %v938_v61  ;;  %v1113_v7 = vsel %vm390_vm12, 1.0, %v1360_v30  ;;  %vm473_vm7 = vmand %vm455_vm14, %vm2228_vm4  ;;  %vm870_vm14 = vcmp.eq.s32.totalorder %v1497_v28, %v270_v49  ;;  %vm2229_vm12 = vnez %v2217_v34  ;;  %v249_v50 = vadd.s32 80, %v1454_v3 }
  0x40   : > { %v771_v8 = vadd.f32 %v1178_v0, %v688_v1  ;;  %v438_v9 = vadd.f32 %v1113_v7, %v1097_v2  ;;  %v1129_v10 = vsel %vm473_vm7, 1.0, %v1360_v30  ;;  %vm556_vm0 = vmand %vm538_vm9, %vm1493_vm10  ;;  %vm286_vm9 = vcmp.eq.s32.totalorder %v1459_v11, %v269_v4 }
  0x41   : > { %v1145_v17 = vsel %vm556_vm0, 1.0, %v1360_v30  ;;  %vm639_vm13 = vmand %vm621_vm5, %vm2224_vm1  ;;  %vm371_vm0 = vcmp.eq.s32.totalorder %v1461_v12, %v269_v4  ;;  %vm537_vm1 = vcmp.eq.s32.totalorder %v1465_v14, %v269_v4  ;;  %v268_v39 = vadd.s32 %v1456_v6, %v250_v25 }
  0x42   : > { %v854_v18 = vadd.f32 %v1194_v5, %v771_v8  ;;  %v521_v23 = vadd.f32 %v1129_v10, %v438_v9  ;;  %vm722_vm7 = vmand %vm704_vm2, %vm2229_vm12  ;;  %v1161_v26 = vsel %vm639_vm13, 1.0, %v1360_v30  ;;  %vm454_vm2 = vcmp.eq.s32.totalorder %v1463_v13, %v269_v4 }
  0x43   : > { %vm805_vm8 = vmand %vm787_vm15, %vm1522_vm6  ;;  %v1177_v35 = vsel %vm722_vm7, 1.0, %v1360_v30  ;;  %vm2232_vm12 = vnez %v2207_v19  ;;  %v267_v58 = vadd.s32 %v1456_v6, %v249_v50  ;;  %v248_v5 = vadd.s32 72, %v1454_v3 }
  0x44   : > { %v937_v29 = vadd.f32 %v1210_v15, %v854_v18  ;;  %v604_v31 = vadd.f32 %v1145_v17, %v521_v23  ;;  %vm1624_vm5 = vmand %vm870_vm14, %vm1530_vm11  ;;  %vm620_vm14 = vcmp.eq.s32.totalorder %v1467_v16, %v269_v4  ;;  %v1193_v41 = vsel %vm805_vm8, 1.0, %v1360_v30 }
  0x45   : > { %vm306_vm13 = vmand %vm286_vm9, %vm2232_vm12  ;;  %vm703_vm9 = vcmp.eq.s32.totalorder %v1478_v21, %v269_v4  ;;  %v1209_v46 = vsel %vm1624_vm5, 1.0, %v1360_v30  ;;  %vm2233_vm8 = vnez %v2215_v32  ;;  %v266_v23 = vadd.s32 %v1456_v6, %v248_v5 }
  0x46   : > { %942 = vmatpush.msra.mxu0 %v937_v29  ;;  %v687_v36 = vadd.f32 %v1161_v26, %v604_v31  ;;  %v1096_v37 = vsel %vm306_vm13, 1.0, %v1360_v30  ;;  %vm389_vm15 = vmand %vm371_vm0, %vm1474_vm3  ;;  %vm786_vm13 = vcmp.eq.s32.totalorder %v1484_v24, %v269_v4 }
  0x47   : > { %v1112_v42 = vsel %vm389_vm15, 1.0, %v1360_v30  ;;  %vm472_vm7 = vmand %vm454_vm2, %vm2228_vm4  ;;  %vm869_vm15 = vcmp.eq.s32.totalorder %v1497_v28, %v269_v4 }
  0x48   : > { %v770_v43 = vadd.f32 %v1177_v35, %v687_v36  ;;  %v437_v44 = vadd.f32 %v1112_v42, %v1096_v37  ;;  %v1128_v45 = vsel %vm472_vm7, 1.0, %v1360_v30  ;;  %vm555_vm0 = vmand %vm537_vm1, %vm1493_vm10  ;;  %vm2234_vm7 = vnez %v2217_v34 }
  0x49   : > { %v1144_v47 = vsel %vm555_vm0, 1.0, %v1360_v30  ;;  %vm638_vm2 = vmand %vm620_vm14, %vm2233_vm8  ;;  %vm285_vm1 = vcmp.eq.s32.totalorder %v1459_v11, %v268_v39  ;;  %vm370_vm0 = vcmp.eq.s32.totalorder %v1461_v12, %v268_v39 }
  0x4a   : > { %v853_v48 = vadd.f32 %v1193_v41, %v770_v43  ;;  %v520_v49 = vadd.f32 %v1128_v45, %v437_v44  ;;  %vm721_vm4 = vmand %vm703_vm9, %vm2234_vm7  ;;  %v1160_v51 = vsel %vm638_vm2, 1.0, %v1360_v30  ;;  %vm453_vm9 = vcmp.eq.s32.totalorder %v1463_v13, %v268_v39 }
  0x4b   : > { %vm804_vm5 = vmand %vm786_vm13, %vm1522_vm6  ;;  %v1176_v55 = vsel %vm721_vm4, 1.0, %v1360_v30  ;;  %vm536_vm7 = vcmp.eq.s32.totalorder %v1465_v14, %v268_v39  ;;  %vm2237_vm4 = vnez %v2211_v22  ;;  %v247_v41 = vadd.s32 64, %v1454_v3 }
  0x4c   : > { %v936_v52 = vadd.f32 %v1209_v46, %v853_v48  ;;  %v603_v53 = vadd.f32 %v1144_v47, %v520_v49  ;;  %vm1664_vm14 = vmand %vm869_vm15, %vm1530_vm11  ;;  %vm619_vm15 = vcmp.eq.s32.totalorder %v1467_v16, %v268_v39  ;;  %v1192_v59 = vsel %vm804_vm5, 1.0, %v1360_v30 }
  0x4d   : > { %vm305_vm2 = vmand %vm285_vm1, %vm2232_vm12  ;;  %vm702_vm12 = vcmp.eq.s32.totalorder %v1478_v21, %v268_v39  ;;  %v1208_v0 = vsel %vm1664_vm14, 1.0, %v1360_v30  ;;  %v265_v49 = vadd.s32 %v1456_v6, %v247_v41 }
  0x4e   : > { %943 = vmatpush.msra.mxu0 %v936_v52  ;;  %v686_v56 = vadd.f32 %v1160_v51, %v603_v53  ;;  %v1095_v57 = vsel %vm305_vm2, 1.0, %v1360_v30  ;;  %vm388_vm13 = vmand %vm370_vm0, %vm1474_vm3  ;;  %vm785_vm2 = vcmp.eq.s32.totalorder %v1484_v24, %v268_v39 }
  0x4f   : > { %v1111_v60 = vsel %vm388_vm13, 1.0, %v1360_v30  ;;  %vm471_vm1 = vmand %vm453_vm9, %vm2237_vm4  ;;  %vm868_vm9 = vcmp.eq.s32.totalorder %v1497_v28, %v268_v39  ;;  %vm2238_vm13 = vnez %v2217_v34 }
  0x50   : > { %v769_v61 = vadd.f32 %v1176_v55, %v686_v56  ;;  %v436_v62 = vadd.f32 %v1111_v60, %v1095_v57  ;;  %v1127_v63 = vsel %vm471_vm1, 1.0, %v1360_v30  ;;  %vm554_vm0 = vmand %vm536_vm7, %vm1493_vm10  ;;  %vm284_vm7 = vcmp.eq.s32.totalorder %v1459_v11, %v267_v58 }
  0x51   : > { %v1143_v1 = vsel %vm554_vm0, 1.0, %v1360_v30  ;;  %vm637_vm5 = vmand %vm619_vm15, %vm2233_vm8  ;;  %vm369_vm0 = vcmp.eq.s32.totalorder %v1461_v12, %v267_v58  ;;  %vm535_vm8 = vcmp.eq.s32.totalorder %v1465_v14, %v267_v58 }
  0x52   : > { %v852_v2 = vadd.f32 %v1192_v59, %v769_v61  ;;  %v519_v4 = vadd.f32 %v1127_v63, %v436_v62  ;;  %vm720_vm1 = vmand %vm702_vm12, %vm2238_vm13  ;;  %v1159_v7 = vsel %vm637_vm5, 1.0, %v1360_v30  ;;  %vm452_vm12 = vcmp.eq.s32.totalorder %v1463_v13, %v267_v58 }
  0x53   : > { %vm803_vm14 = vmand %vm785_vm2, %vm1522_vm6  ;;  %v1175_v15 = vsel %vm720_vm1, 1.0, %v1360_v30  ;;  %vm2241_vm13 = vnez %v2207_v19  ;;  %v246_v59 = vadd.s32 56, %v1454_v3 }
  0x54   : > { %v935_v8 = vadd.f32 %v1208_v0, %v852_v2  ;;  %v602_v9 = vadd.f32 %v1143_v1, %v519_v4  ;;  %vm1704_vm15 = vmand %vm868_vm9, %vm1530_vm11  ;;  %vm618_vm9 = vcmp.eq.s32.totalorder %v1467_v16, %v267_v58  ;;  %v1191_v25 = vsel %vm803_vm14, 1.0, %v1360_v30 }
  0x55   : > { %vm304_vm5 = vmand %vm284_vm7, %vm2241_vm13  ;;  %vm701_vm7 = vcmp.eq.s32.totalorder %v1478_v21, %v267_v58  ;;  %v1207_v35 = vsel %vm1704_vm15, 1.0, %v1360_v30  ;;  %vm2242_vm14 = vnez %v2215_v32  ;;  %v264_v4 = vadd.s32 %v1456_v6, %v246_v59 }
  0x56   : > { %944 = vmatpush.msra.mxu0 %v935_v8  ;;  %v685_v17 = vadd.f32 %v1159_v7, %v602_v9  ;;  %v1094_v18 = vsel %vm304_vm5, 1.0, %v1360_v30  ;;  %vm387_vm2 = vmand %vm369_vm0, %vm1474_vm3  ;;  %vm784_vm5 = vcmp.eq.s32.totalorder %v1484_v24, %v267_v58 }
  0x57   : > { %v1110_v26 = vsel %vm387_vm2, 1.0, %v1360_v30  ;;  %vm470_vm1 = vmand %vm452_vm12, %vm2237_vm4  ;;  %vm867_vm2 = vcmp.eq.s32.totalorder %v1497_v28, %v267_v58 }
  0x58   : > { %v768_v29 = vadd.f32 %v1175_v15, %v685_v17  ;;  %v435_v31 = vadd.f32 %v1110_v26, %v1094_v18  ;;  %v1126_v33 = vsel %vm470_vm1, 1.0, %v1360_v30  ;;  %vm553_vm0 = vmand %vm535_vm8, %vm1493_vm10  ;;  %vm2243_vm1 = vnez %v2217_v34 }
  0x59   : > { %v1142_v36 = vsel %vm553_vm0, 1.0, %v1360_v30  ;;  %vm636_vm12 = vmand %vm618_vm9, %vm2242_vm14  ;;  %vm283_vm8 = vcmp.eq.s32.totalorder %v1459_v11, %v266_v23  ;;  %vm368_vm0 = vcmp.eq.s32.totalorder %v1461_v12, %v266_v23 }
  0x5a   : > { %v851_v37 = vadd.f32 %v1191_v25, %v768_v29  ;;  %v518_v39 = vadd.f32 %v1126_v33, %v435_v31  ;;  %vm719_vm4 = vmand %vm701_vm7, %vm2243_vm1  ;;  %v1158_v42 = vsel %vm636_vm12, 1.0, %v1360_v30  ;;  %vm451_vm7 = vcmp.eq.s32.totalorder %v1463_v13, %v266_v23 }
  0x5b   : > { %vm802_vm15 = vmand %vm784_vm5, %vm1522_vm6  ;;  %v1174_v46 = vsel %vm719_vm4, 1.0, %v1360_v30  ;;  %vm534_vm1 = vcmp.eq.s32.totalorder %v1465_v14, %v266_v23  ;;  %vm2246_vm4 = vnez %v2211_v22  ;;  %v245_v25 = vadd.s32 48, %v1454_v3 }
  0x5c   : > { %v934_v43 = vadd.f32 %v1207_v35, %v851_v37  ;;  %v601_v44 = vadd.f32 %v1142_v36, %v518_v39  ;;  %vm1744_vm9 = vmand %vm867_vm2, %vm1530_vm11  ;;  %vm617_vm2 = vcmp.eq.s32.totalorder %v1467_v16, %v266_v23  ;;  %v1190_v50 = vsel %vm802_vm15, 1.0, %v1360_v30 }
  0x5d   : > { %vm303_vm12 = vmand %vm283_vm8, %vm2241_vm13  ;;  %vm700_vm13 = vcmp.eq.s32.totalorder %v1478_v21, %v266_v23  ;;  %v1206_v55 = vsel %vm1744_vm9, 1.0, %v1360_v30  ;;  %v263_v39 = vadd.s32 %v1456_v6, %v245_v25 }
  0x5e   : > { %945 = vmatpush.msra.mxu0 %v934_v43  ;;  %v684_v47 = vadd.f32 %v1158_v42, %v601_v44  ;;  %v1093_v48 = vsel %vm303_vm12, 1.0, %v1360_v30  ;;  %vm386_vm5 = vmand %vm368_vm0, %vm1474_vm3  ;;  %vm783_vm12 = vcmp.eq.s32.totalorder %v1484_v24, %v266_v23 }
  0x5f   : > { %v1109_v51 = vsel %vm386_vm5, 1.0, %v1360_v30  ;;  %vm469_vm8 = vmand %vm451_vm7, %vm2246_vm4  ;;  %vm866_vm7 = vcmp.eq.s32.totalorder %v1497_v28, %v266_v23  ;;  %vm2247_vm5 = vnez %v2217_v34 }
  0x60   : > { %v767_v52 = vadd.f32 %v1174_v46, %v684_v47  ;;  %v434_v53 = vadd.f32 %v1109_v51, %v1093_v48  ;;  %v1125_v54 = vsel %vm469_vm8, 1.0, %v1360_v30  ;;  %vm552_vm0 = vmand %vm534_vm1, %vm1493_vm10  ;;  %vm282_vm1 = vcmp.eq.s32.totalorder %v1459_v11, %v265_v49 }
  0x61   : > { %v1141_v56 = vsel %vm552_vm0, 1.0, %v1360_v30  ;;  %vm635_vm15 = vmand %vm617_vm2, %vm2242_vm14  ;;  %vm367_vm0 = vcmp.eq.s32.totalorder %v1461_v12, %v265_v49  ;;  %vm533_vm14 = vcmp.eq.s32.totalorder %v1465_v14, %v265_v49 }
  0x62   : > { %v850_v57 = vadd.f32 %v1190_v50, %v767_v52  ;;  %v517_v58 = vadd.f32 %v1125_v54, %v434_v53  ;;  %vm718_vm8 = vmand %vm700_vm13, %vm2247_vm5  ;;  %v1157_v60 = vsel %vm635_vm15, 1.0, %v1360_v30  ;;  %vm450_vm13 = vcmp.eq.s32.totalorder %v1463_v13, %v265_v49 }
  0x63   : > { %vm801_vm9 = vmand %vm783_vm12, %vm1522_vm6  ;;  %v1173_v0 = vsel %vm718_vm8, 1.0, %v1360_v30  ;;  %vm2250_vm5 = vnez %v2207_v19  ;;  %v244_v50 = vadd.s32 40, %v1454_v3 }
  0x64   : > { %v933_v61 = vadd.f32 %v1206_v55, %v850_v57  ;;  %v600_v62 = vadd.f32 %v1141_v56, %v517_v58  ;;  %vm1784_vm2 = vmand %vm866_vm7, %vm1530_vm11  ;;  %vm616_vm7 = vcmp.eq.s32.totalorder %v1467_v16, %v265_v49  ;;  %v1189_v5 = vsel %vm801_vm9, 1.0, %v1360_v30 }
  0x65   : > { %vm302_vm15 = vmand %vm282_vm1, %vm2250_vm5  ;;  %vm699_vm1 = vcmp.eq.s32.totalorder %v1478_v21, %v265_v49  ;;  %v1205_v15 = vsel %vm1784_vm2, 1.0, %v1360_v30  ;;  %vm2251_vm9 = vnez %v2215_v32  ;;  %v262_v58 = vadd.s32 %v1456_v6, %v244_v50 }
  0x66   : > { %946 = vmatpush.msra.mxu0 %v933_v61  ;;  %v683_v1 = vadd.f32 %v1157_v60, %v600_v62  ;;  %v1092_v2 = vsel %vm302_vm15, 1.0, %v1360_v30  ;;  %vm385_vm12 = vmand %vm367_vm0, %vm1474_vm3  ;;  %vm782_vm15 = vcmp.eq.s32.totalorder %v1484_v24, %v265_v49 }
  0x67   : > { %v1108_v7 = vsel %vm385_vm12, 1.0, %v1360_v30  ;;  %vm468_vm8 = vmand %vm450_vm13, %vm2246_vm4  ;;  %vm865_vm12 = vcmp.eq.s32.totalorder %v1497_v28, %v265_v49 }
  0x68   : > { %v766_v8 = vadd.f32 %v1173_v0, %v683_v1  ;;  %v433_v9 = vadd.f32 %v1108_v7, %v1092_v2  ;;  %v1124_v10 = vsel %vm468_vm8, 1.0, %v1360_v30  ;;  %vm551_vm0 = vmand %vm533_vm14, %vm1493_vm10  ;;  %vm2252_vm8 = vnez %v2217_v34 }
  0x69   : > { %v1140_v17 = vsel %vm551_vm0, 1.0, %v1360_v30  ;;  %vm634_vm13 = vmand %vm616_vm7, %vm2251_vm9  ;;  %vm281_vm14 = vcmp.eq.s32.totalorder %v1459_v11, %v264_v4  ;;  %vm366_vm0 = vcmp.eq.s32.totalorder %v1461_v12, %v264_v4 }
  0x6a   : > { %v849_v18 = vadd.f32 %v1189_v5, %v766_v8  ;;  %v516_v23 = vadd.f32 %v1124_v10, %v433_v9  ;;  %vm717_vm4 = vmand %vm699_vm1, %vm2252_vm8  ;;  %v1156_v26 = vsel %vm634_vm13, 1.0, %v1360_v30  ;;  %vm449_vm1 = vcmp.eq.s32.totalorder %v1463_v13, %v264_v4 }
  0x6b   : > { %vm800_vm2 = vmand %vm782_vm15, %vm1522_vm6  ;;  %v1172_v35 = vsel %vm717_vm4, 1.0, %v1360_v30  ;;  %vm532_vm8 = vcmp.eq.s32.totalorder %v1465_v14, %v264_v4  ;;  %vm2255_vm4 = vnez %v2211_v22  ;;  %v243_v5 = vadd.s32 32, %v1454_v3 }
  0x6c   : > { %v932_v29 = vadd.f32 %v1205_v15, %v849_v18  ;;  %v599_v31 = vadd.f32 %v1140_v17, %v516_v23  ;;  %vm1824_vm7 = vmand %vm865_vm12, %vm1530_vm11  ;;  %vm615_vm12 = vcmp.eq.s32.totalorder %v1467_v16, %v264_v4  ;;  %v1188_v41 = vsel %vm800_vm2, 1.0, %v1360_v30 }
  0x6d   : > { %vm301_vm13 = vmand %vm281_vm14, %vm2250_vm5  ;;  %vm698_vm5 = vcmp.eq.s32.totalorder %v1478_v21, %v264_v4  ;;  %v1204_v46 = vsel %vm1824_vm7, 1.0, %v1360_v30  ;;  %v261_v23 = vadd.s32 %v1456_v6, %v243_v5 }
  0x6e   : > { %947 = vmatpush.msra.mxu0 %v932_v29  ;;  %v682_v36 = vadd.f32 %v1156_v26, %v599_v31  ;;  %v1091_v37 = vsel %vm301_vm13, 1.0, %v1360_v30  ;;  %vm384_vm15 = vmand %vm366_vm0, %vm1474_vm3  ;;  %vm781_vm13 = vcmp.eq.s32.totalorder %v1484_v24, %v264_v4 }
  0x6f   : > { %v1107_v42 = vsel %vm384_vm15, 1.0, %v1360_v30  ;;  %vm467_vm14 = vmand %vm449_vm1, %vm2255_vm4  ;;  %vm864_vm1 = vcmp.eq.s32.totalorder %v1497_v28, %v264_v4  ;;  %vm2256_vm15 = vnez %v2217_v34 }
  0x70   : > { %v765_v43 = vadd.f32 %v1172_v35, %v682_v36  ;;  %v432_v44 = vadd.f32 %v1107_v42, %v1091_v37  ;;  %v1123_v45 = vsel %vm467_vm14, 1.0, %v1360_v30  ;;  %vm550_vm0 = vmand %vm532_vm8, %vm1493_vm10  ;;  %vm280_vm8 = vcmp.eq.s32.totalorder %v1459_v11, %v263_v39 }
  0x71   : > { %v1139_v47 = vsel %vm550_vm0, 1.0, %v1360_v30  ;;  %vm633_vm2 = vmand %vm615_vm12, %vm2251_vm9  ;;  %vm365_vm0 = vcmp.eq.s32.totalorder %v1461_v12, %v263_v39  ;;  %vm531_vm9 = vcmp.eq.s32.totalorder %v1465_v14, %v263_v39 }
  0x72   : > { %v848_v48 = vadd.f32 %v1188_v41, %v765_v43  ;;  %v515_v49 = vadd.f32 %v1123_v45, %v432_v44  ;;  %vm716_vm14 = vmand %vm698_vm5, %vm2256_vm15  ;;  %v1155_v51 = vsel %vm633_vm2, 1.0, %v1360_v30  ;;  %vm448_vm5 = vcmp.eq.s32.totalorder %v1463_v13, %v263_v39 }
  0x73   : > { %vm799_vm7 = vmand %vm781_vm13, %vm1522_vm6  ;;  %v1171_v55 = vsel %vm716_vm14, 1.0, %v1360_v30  ;;  %vm2259_vm15 = vnez %v2207_v19  ;;  %v242_v41 = vadd.s32 24, %v1454_v3 }
  0x74   : > { %v931_v52 = vadd.f32 %v1204_v46, %v848_v48  ;;  %v598_v53 = vadd.f32 %v1139_v47, %v515_v49  ;;  %vm1864_vm12 = vmand %vm864_vm1, %vm1530_vm11  ;;  %vm614_vm1 = vcmp.eq.s32.totalorder %v1467_v16, %v263_v39  ;;  %v1187_v59 = vsel %vm799_vm7, 1.0, %v1360_v30 }
  0x75   : > { %vm300_vm2 = vmand %vm280_vm8, %vm2259_vm15  ;;  %vm697_vm8 = vcmp.eq.s32.totalorder %v1478_v21, %v263_v39  ;;  %v1203_v0 = vsel %vm1864_vm12, 1.0, %v1360_v30  ;;  %vm2260_vm7 = vnez %v2215_v32  ;;  %v260_v49 = vadd.s32 %v1456_v6, %v242_v41 }
  0x76   : > { %948 = vmatpush.msra.mxu0 %v931_v52  ;;  %v681_v56 = vadd.f32 %v1155_v51, %v598_v53  ;;  %v1090_v57 = vsel %vm300_vm2, 1.0, %v1360_v30  ;;  %vm383_vm13 = vmand %vm365_vm0, %vm1474_vm3  ;;  %vm780_vm2 = vcmp.eq.s32.totalorder %v1484_v24, %v263_v39 }
  0x77   : > { %v1106_v60 = vsel %vm383_vm13, 1.0, %v1360_v30  ;;  %vm466_vm14 = vmand %vm448_vm5, %vm2255_vm4  ;;  %vm863_vm13 = vcmp.eq.s32.totalorder %v1497_v28, %v263_v39 }
  0x78   : > { %v764_v61 = vadd.f32 %v1171_v55, %v681_v56  ;;  %v431_v62 = vadd.f32 %v1106_v60, %v1090_v57  ;;  %v1122_v63 = vsel %vm466_vm14, 1.0, %v1360_v30  ;;  %vm549_vm0 = vmand %vm531_vm9, %vm1493_vm10  ;;  %vm2261_vm14 = vnez %v2217_v34 }
  0x79   : > { %v1138_v1 = vsel %vm549_vm0, 1.0, %v1360_v30  ;;  %vm632_vm5 = vmand %vm614_vm1, %vm2260_vm7  ;;  %vm279_vm9 = vcmp.eq.s32.totalorder %v1459_v11, %v262_v58  ;;  %vm364_vm0 = vcmp.eq.s32.totalorder %v1461_v12, %v262_v58 }
  0x7a   : > { %v847_v2 = vadd.f32 %v1187_v59, %v764_v61  ;;  %v514_v4 = vadd.f32 %v1122_v63, %v431_v62  ;;  %vm715_vm4 = vmand %vm697_vm8, %vm2261_vm14  ;;  %v1154_v7 = vsel %vm632_vm5, 1.0, %v1360_v30  ;;  %vm447_vm8 = vcmp.eq.s32.totalorder %v1463_v13, %v262_v58 }
  0x7b   : > { %vm798_vm12 = vmand %vm780_vm2, %vm1522_vm6  ;;  %v1170_v15 = vsel %vm715_vm4, 1.0, %v1360_v30  ;;  %vm530_vm14 = vcmp.eq.s32.totalorder %v1465_v14, %v262_v58  ;;  %vm2264_vm4 = vnez %v2211_v22  ;;  %v241_v59 = vadd.s32 16, %v1454_v3 }
  0x7c   : > { %v930_v8 = vadd.f32 %v1203_v0, %v847_v2  ;;  %v597_v9 = vadd.f32 %v1138_v1, %v514_v4  ;;  %vm1904_vm1 = vmand %vm863_vm13, %vm1530_vm11  ;;  %vm613_vm13 = vcmp.eq.s32.totalorder %v1467_v16, %v262_v58  ;;  %v1186_v25 = vsel %vm798_vm12, 1.0, %v1360_v30 }
  0x7d   : > { %vm299_vm5 = vmand %vm279_vm9, %vm2259_vm15  ;;  %vm696_vm15 = vcmp.eq.s32.totalorder %v1478_v21, %v262_v58  ;;  %v1202_v35 = vsel %vm1904_vm1, 1.0, %v1360_v30  ;;  %v259_v4 = vadd.s32 %v1456_v6, %v241_v59 }
  0x7e   : > { %949 = vmatpush.msra.mxu0 %v930_v8  ;;  %v680_v17 = vadd.f32 %v1154_v7, %v597_v9  ;;  %v1089_v18 = vsel %vm299_vm5, 1.0, %v1360_v30  ;;  %vm382_vm2 = vmand %vm364_vm0, %vm1474_vm3  ;;  %vm779_vm5 = vcmp.eq.s32.totalorder %v1484_v24, %v262_v58 }
  0x7f   : > { %v1105_v26 = vsel %vm382_vm2, 1.0, %v1360_v30  ;;  %vm465_vm9 = vmand %vm447_vm8, %vm2264_vm4  ;;  %vm862_vm8 = vcmp.eq.s32.totalorder %v1497_v28, %v262_v58  ;;  %vm2265_vm2 = vnez %v2217_v34 }
  0x80   : > { %v763_v29 = vadd.f32 %v1170_v15, %v680_v17  ;;  %v430_v31 = vadd.f32 %v1105_v26, %v1089_v18  ;;  %v1121_v33 = vsel %vm465_vm9, 1.0, %v1360_v30  ;;  %vm548_vm0 = vmand %vm530_vm14, %vm1493_vm10  ;;  %vm278_vm14 = vcmp.eq.s32.totalorder %v1459_v11, %v261_v23 }
  0x81   : > { %v1137_v36 = vsel %vm548_vm0, 1.0, %v1360_v30  ;;  %vm631_vm12 = vmand %vm613_vm13, %vm2260_vm7  ;;  %vm363_vm0 = vcmp.eq.s32.totalorder %v1461_v12, %v261_v23  ;;  %vm529_vm7 = vcmp.eq.s32.totalorder %v1465_v14, %v261_v23 }
  0x82   : > { %v846_v37 = vadd.f32 %v1186_v25, %v763_v29  ;;  %v513_v39 = vadd.f32 %v1121_v33, %v430_v31  ;;  %vm714_vm9 = vmand %vm696_vm15, %vm2265_vm2  ;;  %v1153_v42 = vsel %vm631_vm12, 1.0, %v1360_v30  ;;  %vm446_vm15 = vcmp.eq.s32.totalorder %v1463_v13, %v261_v23 }
  0x83   : > { %vm797_vm1 = vmand %vm779_vm5, %vm1522_vm6  ;;  %v1169_v46 = vsel %vm714_vm9, 1.0, %v1360_v30  ;;  %vm2268_vm2 = vnez %v2207_v19  ;;  %v240_v25 = vadd.s32 8, %v1454_v3 }
  0x84   : > { %v929_v43 = vadd.f32 %v1202_v35, %v846_v37  ;;  %v596_v44 = vadd.f32 %v1137_v36, %v513_v39  ;;  %vm1944_vm13 = vmand %vm862_vm8, %vm1530_vm11  ;;  %vm612_vm8 = vcmp.eq.s32.totalorder %v1467_v16, %v261_v23  ;;  %v1185_v50 = vsel %vm797_vm1, 1.0, %v1360_v30 }
  0x85   : > { %vm298_vm12 = vmand %vm278_vm14, %vm2268_vm2  ;;  %vm695_vm14 = vcmp.eq.s32.totalorder %v1478_v21, %v261_v23  ;;  %v1201_v55 = vsel %vm1944_vm13, 1.0, %v1360_v30  ;;  %vm2269_vm1 = vnez %v2215_v32  ;;  %v258_v39 = vadd.s32 %v1456_v6, %v240_v25 }
  0x86   : > { %950 = vmatpush.msra.mxu0 %v929_v43  ;;  %v679_v47 = vadd.f32 %v1153_v42, %v596_v44  ;;  %v1088_v48 = vsel %vm298_vm12, 1.0, %v1360_v30  ;;  %vm381_vm5 = vmand %vm363_vm0, %vm1474_vm3  ;;  %vm778_vm12 = vcmp.eq.s32.totalorder %v1484_v24, %v261_v23 }
  0x87   : > { %v1104_v51 = vsel %vm381_vm5, 1.0, %v1360_v30  ;;  %vm464_vm9 = vmand %vm446_vm15, %vm2264_vm4  ;;  %vm861_vm5 = vcmp.eq.s32.totalorder %v1497_v28, %v261_v23 }
  0x88   : > { %v762_v52 = vadd.f32 %v1169_v46, %v679_v47  ;;  %v429_v53 = vadd.f32 %v1104_v51, %v1088_v48  ;;  %v1120_v54 = vsel %vm464_vm9, 1.0, %v1360_v30  ;;  %vm547_vm0 = vmand %vm529_vm7, %vm1493_vm10  ;;  %vm2270_vm9 = vnez %v2217_v34 }
  0x89   : > { %v1136_v56 = vsel %vm547_vm0, 1.0, %v1360_v30  ;;  %vm630_vm15 = vmand %vm612_vm8, %vm2269_vm1  ;;  %vm277_vm7 = vcmp.eq.s32.totalorder %v1459_v11, %v260_v49  ;;  %vm362_vm0 = vcmp.eq.s32.totalorder %v1461_v12, %v260_v49 }
  0x8a   : > { %v845_v57 = vadd.f32 %v1185_v50, %v762_v52  ;;  %v512_v58 = vadd.f32 %v1120_v54, %v429_v53  ;;  %vm713_vm4 = vmand %vm695_vm14, %vm2270_vm9  ;;  %v1152_v60 = vsel %vm630_vm15, 1.0, %v1360_v30  ;;  %vm445_vm14 = vcmp.eq.s32.totalorder %v1463_v13, %v260_v49 }
  0x8b   : > { %vm796_vm13 = vmand %vm778_vm12, %vm1522_vm6  ;;  %v1168_v0 = vsel %vm713_vm4, 1.0, %v1360_v30  ;;  %vm528_vm9 = vcmp.eq.s32.totalorder %v1465_v14, %v260_v49  ;;  %vm2273_vm4 = vnez %v2211_v22 }
  0x8c   : > { %v928_v61 = vadd.f32 %v1201_v55, %v845_v57  ;;  %v595_v62 = vadd.f32 %v1136_v56, %v512_v58  ;;  %vm1984_vm8 = vmand %vm861_vm5, %vm1530_vm11  ;;  %vm611_vm5 = vcmp.eq.s32.totalorder %v1467_v16, %v260_v49  ;;  %v1184_v5 = vsel %vm796_vm13, 1.0, %v1360_v30 }
  0x8d   : > { %vm297_vm15 = vmand %vm277_vm7, %vm2268_vm2  ;;  %vm694_vm2 = vcmp.eq.s32.totalorder %v1478_v21, %v260_v49  ;;  %v1200_v15 = vsel %vm1984_vm8, 1.0, %v1360_v30  ;;  %v257_v57 = vadd.s32 %v1456_v6, %v1454_v3 }
  0x8e   : > { %951 = vmatpush.msra.mxu0 %v928_v61  ;;  %v678_v1 = vadd.f32 %v1152_v60, %v595_v62  ;;  %v1087_v2 = vsel %vm297_vm15, 1.0, %v1360_v30  ;;  %vm380_vm12 = vmand %vm362_vm0, %vm1474_vm3  ;;  %vm777_vm15 = vcmp.eq.s32.totalorder %v1484_v24, %v260_v49 }
  0x8f   : > { %v1103_v7 = vsel %vm380_vm12, 1.0, %v1360_v30  ;;  %vm463_vm7 = vmand %vm445_vm14, %vm2273_vm4  ;;  %vm860_vm14 = vcmp.eq.s32.totalorder %v1497_v28, %v260_v49  ;;  %vm2274_vm12 = vnez %v2217_v34 }
  0x90   : > { %v761_v8 = vadd.f32 %v1168_v0, %v678_v1  ;;  %v428_v9 = vadd.f32 %v1103_v7, %v1087_v2  ;;  %v1119_v10 = vsel %vm463_vm7, 1.0, %v1360_v30  ;;  %vm546_vm0 = vmand %vm528_vm9, %vm1493_vm10  ;;  %vm276_vm9 = vcmp.eq.s32.totalorder %v1459_v11, %v259_v4 }
  0x91   : > { %v1135_v17 = vsel %vm546_vm0, 1.0, %v1360_v30  ;;  %vm629_vm13 = vmand %vm611_vm5, %vm2269_vm1  ;;  %vm361_vm0 = vcmp.eq.s32.totalorder %v1461_v12, %v259_v4  ;;  %vm527_vm1 = vcmp.eq.s32.totalorder %v1465_v14, %v259_v4 }
  0x92   : > { %v844_v18 = vadd.f32 %v1184_v5, %v761_v8  ;;  %v511_v23 = vadd.f32 %v1119_v10, %v428_v9  ;;  %vm712_vm7 = vmand %vm694_vm2, %vm2274_vm12  ;;  %v1151_v26 = vsel %vm629_vm13, 1.0, %v1360_v30  ;;  %vm444_vm2 = vcmp.eq.s32.totalorder %v1463_v13, %v259_v4 }
  0x93   : > { %vm795_vm8 = vmand %vm777_vm15, %vm1522_vm6  ;;  %v1167_v35 = vsel %vm712_vm7, 1.0, %v1360_v30  ;;  %vm2277_vm12 = vnez %v2207_v19 }
  0x94   : > { %v927_v29 = vadd.f32 %v1200_v15, %v844_v18  ;;  %v594_v31 = vadd.f32 %v1135_v17, %v511_v23  ;;  %vm2024_vm5 = vmand %vm860_vm14, %vm1530_vm11  ;;  %vm610_vm14 = vcmp.eq.s32.totalorder %v1467_v16, %v259_v4  ;;  %v1183_v41 = vsel %vm795_vm8, 1.0, %v1360_v30 }
  0x95   : > { %vm296_vm13 = vmand %vm276_vm9, %vm2277_vm12  ;;  %vm693_vm9 = vcmp.eq.s32.totalorder %v1478_v21, %v259_v4  ;;  %v1199_v46 = vsel %vm2024_vm5, 1.0, %v1360_v30  ;;  %vm2278_vm8 = vnez %v2215_v32  ;;  %vm360_vm5 = vcmp.eq.s32.totalorder %v1461_v12, %v258_v39 }
  0x96   : > { %952 = vmatpush.msra.mxu0 %v927_v29  ;;  %v677_v36 = vadd.f32 %v1151_v26, %v594_v31  ;;  %v1086_v37 = vsel %vm296_vm13, 1.0, %v1360_v30  ;;  %vm379_vm15 = vmand %vm361_vm0, %vm1474_vm3  ;;  %vm776_vm13 = vcmp.eq.s32.totalorder %v1484_v24, %v259_v4 }
  0x97   : > { %v1102_v42 = vsel %vm379_vm15, 1.0, %v1360_v30  ;;  %vm462_vm7 = vmand %vm444_vm2, %vm2273_vm4  ;;  %vm859_vm15 = vcmp.eq.s32.totalorder %v1497_v28, %v259_v4 }
  0x98   : > { %v760_v43 = vadd.f32 %v1167_v35, %v677_v36  ;;  %v427_v44 = vadd.f32 %v1102_v42, %v1086_v37  ;;  %v1118_v45 = vsel %vm462_vm7, 1.0, %v1360_v30  ;;  %vm545_vm0 = vmand %vm527_vm1, %vm1493_vm10  ;;  %vm2279_vm7 = vnez %v2217_v34 }
  0x99   : > { %v1134_v47 = vsel %vm545_vm0, 1.0, %v1360_v30  ;;  %vm628_vm2 = vmand %vm610_vm14, %vm2278_vm8  ;;  %vm275_vm1 = vcmp.eq.s32.totalorder %v1459_v11, %v258_v39  ;;  %vm443_vm0 = vcmp.eq.s32.totalorder %v1463_v13, %v258_v39 }
  0x9a   : > { %v843_v48 = vadd.f32 %v1183_v41, %v760_v43  ;;  %v510_v49 = vadd.f32 %v1118_v45, %v427_v44  ;;  %vm711_vm4 = vmand %vm693_vm9, %vm2279_vm7  ;;  %v1150_v50 = vsel %vm628_vm2, 1.0, %v1360_v30  ;;  %vm526_vm2 = vcmp.eq.s32.totalorder %v1465_v14, %v258_v39 }
  0x9b   : > { %vm794_vm10 = vmand %vm776_vm13, %vm1522_vm6  ;;  %v1166_v54 = vsel %vm711_vm4, 1.0, %v1360_v30  ;;  %vm2282_vm4 = vnez %v2211_v22 }
  0x9c   : > { %v926_v51 = vadd.f32 %v1199_v46, %v843_v48  ;;  %v593_v52 = vadd.f32 %v1134_v47, %v510_v49  ;;  %vm2063_vm14 = vmand %vm859_vm15, %vm1530_vm11  ;;  %vm609_vm15 = vcmp.eq.s32.totalorder %v1467_v16, %v258_v39  ;;  %v1182_v58 = vsel %vm794_vm10, 1.0, %v1360_v30 }
  0x9d   : > { %vm295_vm9 = vmand %vm275_vm1, %vm2277_vm12  ;;  %vm692_vm12 = vcmp.eq.s32.totalorder %v1478_v21, %v258_v39  ;;  %v1198_v3 = vsel %vm2063_vm14, 1.0, %v1360_v30  ;;  %vm359_vm14 = vcmp.eq.s32.totalorder %v1461_v12, %v257_v57 }
  0x9e   : > { %953 = vmatpush.msra.mxu0 %v926_v51  ;;  %v676_v55 = vadd.f32 %v1150_v50, %v593_v52  ;;  %v1085_v56 = vsel %vm295_vm9, 1.0, %v1360_v30  ;;  %vm378_vm13 = vmand %vm360_vm5, %vm1474_vm3  ;;  %vm2283_vm5 = vnez %v2213_v27  ;;  %vm775_vm3 = vcmp.eq.s32.totalorder %v1484_v24, %v258_v39 }
  0x9f   : > { %v1101_v59 = vsel %vm378_vm13, 1.0, %v1360_v30  ;;  %vm461_vm1 = vmand %vm443_vm0, %vm2282_vm4  ;;  %vm858_vm0 = vcmp.eq.s32.totalorder %v1497_v28, %v258_v39 }
  0xa0   : > { %v759_v60 = vadd.f32 %v1166_v54, %v676_v55  ;;  %v426_v61 = vadd.f32 %v1101_v59, %v1085_v56  ;;  %v1117_v62 = vsel %vm461_vm1, 1.0, %v1360_v30  ;;  %vm544_vm9 = vmand %vm526_vm2, %vm2283_vm5  ;;  %vm274_vm2 = vcmp.eq.s32.totalorder %v1459_v11, %v257_v57 }
  0xa1   : > { %v1133_v6 = vsel %vm544_vm9, 1.0, %v1360_v30  ;;  %vm627_vm10 = vmand %vm609_vm15, %vm2278_vm8  ;;  %vm442_vm9 = vcmp.eq.s32.totalorder %v1463_v13, %v257_v57 }
  0xa2   : > { %v842_v63 = vadd.f32 %v1182_v58, %v759_v60  ;;  %v509_v0 = vadd.f32 %v1117_v62, %v426_v61  ;;  %vm710_vm13 = vmand %vm692_vm12, %vm2279_vm7  ;;  %v1149_v1 = vsel %vm627_vm10, 1.0, %v1360_v30  ;;  %vm2286_vm12 = vnez %v2207_v19 }
  0xa3   : > { %vm793_vm1 = vmand %vm775_vm3, %vm1522_vm6  ;;  %v1165_v7 = vsel %vm710_vm13, 1.0, %v1360_v30  ;;  %vm525_vm7 = vcmp.eq.s32.totalorder %v1465_v14, %v257_v57  ;;  %vm2287_vm3 = vnez %v2209_v20 }
  0xa4   : > { %v925_v2 = vadd.f32 %v1198_v3, %v842_v63  ;;  %v592_v4 = vadd.f32 %v1133_v6, %v509_v0  ;;  %vm2103_vm15 = vmand %vm858_vm0, %vm1530_vm11  ;;  %vm608_vm0 = vcmp.eq.s32.totalorder %v1467_v16, %v257_v57  ;;  %v1181_v8 = vsel %vm793_vm1, 1.0, %v1360_v30 }
  0xa5   : > { %vm294_vm10 = vmand %vm274_vm2, %vm2286_vm12  ;;  %vm691_vm2 = vcmp.eq.s32.totalorder %v1478_v21, %v257_v57  ;;  %v1197_v16 = vsel %vm2103_vm15, 1.0, %v1360_v30  ;;  %vm2288_vm1 = vnez %v2217_v34 }
  0xa6   : > { %954 = vmatpush.msra.mxu0 %v925_v2  ;;  %v675_v11 = vadd.f32 %v1149_v1, %v592_v4  ;;  %v1084_v12 = vsel %vm294_vm10, 1.0, %v1360_v30  ;;  %vm377_vm6 = vmand %vm359_vm14, %vm2287_vm3 }
  0xa7   : > { %v1100_v13 = vsel %vm377_vm6, 1.0, %v1360_v30  ;;  %vm460_vm13 = vmand %vm442_vm9, %vm2282_vm4  ;;  %vm774_vm4 = vcmp.eq.s32.totalorder %v1484_v24, %v257_v57  ;;  %vm962_vm9 = vcmask 31744  }
  0xa8   : > { %v758_v19 = vadd.f32 %v1165_v7, %v675_v11  ;;  %v425_v14 = vadd.f32 %v1100_v13, %v1084_v12  ;;  %v1116_v9 = vsel %vm460_vm13, 1.0, %v1360_v30  ;;  %vm543_vm12 = vmand %vm525_vm7, %vm2283_vm5  ;;  %vm857_vm7 = vcmp.eq.s32.totalorder %v1497_v28, %v257_v57  ;;  %v940_v28 = vld [vmem:[%s190_s11] sm:$0xff] }
  0xa9   : > { %v1132_v20 = vsel %vm543_vm12, 1.0, %v1360_v30  ;;  %vm626_vm6 = vmand %vm608_vm0, %vm2278_vm8  ;;  %vm2289_vm5 = vnez %v2219_v38  ;;  %v939_v38 = vld [vmem:[#allocation2] sm:$0xff] }
  0xaa   : > { %v841_v22 = vadd.f32 %v1181_v8, %v758_v19  ;;  %v508_v21 = vadd.f32 %v1116_v9, %v425_v14  ;;  %vm709_vm14 = vmand %vm691_vm2, %vm2288_vm1  ;;  %v1148_v27 = vsel %vm626_vm6, 1.0, %v1360_v30 }
  0xab   : > { %vm792_vm15 = vmand %vm774_vm4, %vm2289_vm5  ;;  %v1164_v32 = vsel %vm709_vm14, 1.0, %v1360_v30 }
  0xac   : > { %v924_v10 = vadd.f32 %v1197_v16, %v841_v22  ;;  %v591_v15 = vadd.f32 %v1132_v20, %v508_v21  ;;  %vm875_vm8 = vmand %vm857_vm7, %vm1530_vm11  ;;  %v1180_v24 = vsel %vm792_vm15, 1.0, %v1360_v30 }
  0xad   : > { %v1196_v18 = vsel %vm875_vm8, 1.0, %v1360_v30 }
  0xae   : > { %955 = vmatpush.msra.mxu0 %v924_v10  ;;  %v674_v17 = vadd.f32 %v1148_v27, %v591_v15 }
  0xb0   : > { %v757_v34 = vadd.f32 %v1164_v32, %v674_v17 }
  0xb2   : > { %v840_v23 = vadd.f32 %v1180_v24, %v757_v34 }
  0xb4   : > { %v923_v25 = vadd.f32 %v1196_v18, %v840_v23 }
  0xb6   : > { %956 = vmatpush.msra.mxu0 %v923_v25 }
  0xb7   : > { %957 = vmatmul.f32.vlgmr.msra.gmra.mxu0 %v940_v28 }
 0x133   : > { %967 = sbr.rel (%p1212_p0) target bundleno = 325 (0x145), region = 44 }
 0x134   : > { %v958_v26 = vpop.f32.mrf.mxu0 }
 0x135   : > { %v961_v29 = vadd.f32 %v958_v26, %v939_v38 }
 0x137   : > { %963 = vst.msk [vmem:[#allocation2] sm:$0xff] %vm962_vm9, %v961_v29 }
 0x138   : > { %v969_v40 = vld [vmem:[%s2170_s1] sm:$0x1] }
 0x139   : > { %1274 = vrcp.f32 %v969_v40 }
 0x13e   : > { %v968_v31 = vld [vmem:[#allocation2] sm:$0xff] }
 0x13f   : > { %v1275_v30 = vpop.eup %1274 }
 0x140   : > { %v972_v33 = vperm.slane %v1275_v30, 0 }
 0x142   : > { %v974_v35 = vmul.f32 %v972_v33, %v968_v31 }
 0x144   : > { %975 = vst.msk [vmem:[%s2172_s3] sm:$0xff] %vm962_vm9, %v974_v35 }
 0x145 PF: > { %s16_s17 = sadd.s32 1, %s1356_s17   ;;  %s2290_s12 = smov %s1340_s13 }
 0x146   : > { %p13_p1 = scmp.ge.s32.totalorder %s16_s17, 4   ;;  %s2291_s13 = smov %s1344_s14 }
 0x147   : > { %s2292_s14 = smov %s1430_s24  ;;  %s2293_s15 = smov %s1352_s16 }
 0x148   : > { %s2294_s16 = smov %s2296_s19  ;;  %15 = sbr.rel (!%p13_p1) target bundleno = 4 (0x4), region = 86 }
 0x14d   :  { %995 = vsyncpa [#allocation4], 1 }
 0x14e   :  { %997 = vsyncpa [#allocation4 + $0x1], 1 }

</bundles_post_ra>
